<compile_context>
chip_gen: v7x
topology: tpu7x:2x2x1
jax: 0.10.0
libtpu: 0.0.40
codegen_flags: <defaults>
</compile_context>

<pallas_src>
import functools
import math

import jax
import jax.numpy as jnp
from jax import lax
from jax.experimental import pallas as pl
from jax.experimental.pallas import tpu as pltpu


def _round_up(x, m):
    return ((x + m - 1) // m) * m


# ---------------------------------------------------------------------------
# Kernel bodies
# ---------------------------------------------------------------------------
def _forward_tile(anchor_ref, positive_ref, mask_ref,
                  wp_ref, bp_ref, wpt_ref, bpt_ref,
                  w1_ref, b1_ref, w2_ref, b2_ref, ww_ref,
                  logits_ref, anchor_out_ref, positive_out_ref):
    """One anchor-row tile of the ContrastModel forward.

    Matmul operands are bf16, accumulation f32 (MXU-native).  The positive
    projection is recomputed per tile (identical in every tile, tiny GEMM) so
    the grid axis stays truly parallel; at the toy size the grid is (1,).
    """
    bf = jnp.bfloat16

    # positive = projector_target(positive)
    p = jnp.dot(positive_ref[...].astype(bf), wpt_ref[...],
                preferred_element_type=jnp.float32) + bpt_ref[...]

    # anchor = projector(anchor)
    a = jnp.dot(anchor_ref[...].astype(bf), wp_ref[...],
                preferred_element_type=jnp.float32) + bp_ref[...]

    # anchor = anchor + anchor_mlp(anchor)   (Linear -> ReLU -> Linear)
    h = jnp.dot(a.astype(bf), w1_ref[...],
                preferred_element_type=jnp.float32) + b1_ref[...]
    h = jnp.maximum(h, 0.0)
    a = a + (jnp.dot(h.astype(bf), w2_ref[...],
                     preferred_element_type=jnp.float32) + b2_ref[...])

    # pred = W(anchor)
    pred = jnp.dot(a.astype(bf), ww_ref[...],
                   preferred_element_type=jnp.float32)

    # logits = pred @ positive.T -- contract last dims of both operands so the
    # MXU is fed directly (no in-kernel transpose / relayout of `p`).
    logits = lax.dot_general(
        pred.astype(bf), p.astype(bf),
        dimension_numbers=(((1,), (1,)), ((), ())),
        preferred_element_type=jnp.float32)

    # Padded positive rows carry the target bias -> their columns are masked
    # out of the row max by a precomputed additive mask (0 valid / -1e30 pad).
    logits = logits + mask_ref[...]
    logits = logits - jnp.max(logits, axis=1, keepdims=True)

    logits_ref[...] = logits
    anchor_out_ref[...] = a
    positive_out_ref[...] = p


def _contrast_kernel_shared(anchor_ref, positive_ref, mask_ref,
                            wp_ref, bp_ref,
                            w1_ref, b1_ref, w2_ref, b2_ref, ww_ref,
                            logits_ref, anchor_out_ref, positive_out_ref):
    """projector_target is byte-identical to projector: reuse wp/bp for both
    branches (one weight resident in VMEM, two dots -- no concat, no slices)."""
    _forward_tile(anchor_ref, positive_ref, mask_ref,
                  wp_ref, bp_ref, wp_ref, bp_ref,
                  w1_ref, b1_ref, w2_ref, b2_ref, ww_ref,
                  logits_ref, anchor_out_ref, positive_out_ref)


# ---------------------------------------------------------------------------
# Wrapper
# ---------------------------------------------------------------------------
@functools.partial(jax.jit, static_argnames=("shared_target",))
def contrast_forward(anchor, positive, prepared, *, shared_target=False):
    """ContrastModel forward in one Pallas kernel.

    anchor, positive: (B, latent_size) f32.  `prepared` = prepare_params(...)
    (weights already padded / bf16-cast once at init).
    Returns (logits (B,B), anchor (B,256), positive (B,256)), all f32.
    shared_target=True reuses the projector weights for the target branch --
    only valid while the target weights are byte-identical to the projector.
    """
    B, L = anchor.shape
    proj_dim = prepared["wp"].shape[1]            # 256
    Hp = prepared["w1"].shape[1]                  # padded MLP hidden dim

    # Asymmetric row padding: anchor rows only need bf16 sublane packing (16);
    # positive rows become the logits lane (last) dim and must be 128-dense.
    Bp_a = max(_round_up(B, 16), 16)
    Bp_p = max(_round_up(B, 128), 128)
    if Bp_a > 512:                                # row-tile for large batches
        Bp_a = _round_up(Bp_a, 512)
        tile_m = 512
    else:
        tile_m = Bp_a
    grid_m = Bp_a // tile_m

    anchor_p = jnp.pad(anchor, ((0, Bp_a - B), (0, 0)))
    positive_p = jnp.pad(positive, ((0, Bp_p - B), (0, 0)))
    col_mask = jnp.where(jnp.arange(Bp_p) < B, 0.0, -1e30).astype(
        jnp.float32).reshape(1, Bp_p)

    if shared_target:
        kernel = _contrast_kernel_shared
        weight_names = ("wp", "bp", "w1", "b1", "w2", "b2", "ww")
    else:
        kernel = _forward_tile
        weight_names = ("wp", "bp", "wpt", "bpt", "w1", "b1", "w2", "b2", "ww")
    weights = tuple(prepared[k] for k in weight_names)
    args = (anchor_p, positive_p, col_mask) + weights

    row_tiled = lambda shape: pl.BlockSpec(shape, lambda i: (i, 0))
    resident = lambda shape: pl.BlockSpec(shape, lambda i: (0, 0))

    in_specs = ([row_tiled((tile_m, L)),          # anchor: tiled over rows
                 resident((Bp_p, L)),             # positive: VMEM-resident
                 resident((1, Bp_p))]             # column mask
                + [resident(w.shape) for w in weights])
    out_specs = (row_tiled((tile_m, Bp_p)),       # logits (lane-dense cols)
                 row_tiled((tile_m, proj_dim)),   # anchor out
                 resident((Bp_p, proj_dim)))      # positive out
    out_shape = (jax.ShapeDtypeStruct((Bp_a, Bp_p), jnp.float32),
                 jax.ShapeDtypeStruct((Bp_a, proj_dim), jnp.float32),
                 jax.ShapeDtypeStruct((Bp_p, proj_dim), jnp.float32))

    flops = 2 * (Bp_a * L * proj_dim                 # projector(anchor)
                 + grid_m * Bp_p * L * proj_dim      # projector_target (per tile)
                 + Bp_a * proj_dim * Hp              # MLP layer 1
                 + Bp_a * Hp * proj_dim              # MLP layer 2
                 + Bp_a * proj_dim * proj_dim        # W
                 + Bp_a * proj_dim * Bp_p)           # logits
    bytes_accessed = (sum(x.size * x.dtype.itemsize for x in args)
                      + sum(math.prod(s.shape) * jnp.dtype(s.dtype).itemsize
                            for s in out_shape))

    logits, a_out, p_out = pl.pallas_call(
        kernel,
        out_shape=out_shape,
        grid=(grid_m,),
        in_specs=in_specs,
        out_specs=out_specs,
        compiler_params=pltpu.CompilerParams(
            dimension_semantics=("parallel",)),
        cost_estimate=pl.CostEstimate(flops=flops, transcendentals=0,
                                      bytes_accessed=bytes_accessed),
    )(*args)

    return logits[:B, :B], a_out[:B], p_out[:B]


# ---------------------------------------------------------------------------
# Params / references
# ---------------------------------------------------------------------------
def init_params(key, latent_size, anchor_hidden_size, proj_dim=256):
    """Deterministic synthetic init; weights stored pre-transposed (in, out)."""
    ks = jax.random.split(key, 8)

    def lin(kw, kb, fan_in, fan_out, bias=True):
        bound = 1.0 / jnp.sqrt(jnp.float32(fan_in))
        w = jax.random.uniform(kw, (fan_in, fan_out), jnp.float32, -bound, bound)
        b = (jax.random.uniform(kb, (1, fan_out), jnp.float32, -bound, bound)
             if bias else None)
        return w, b

    wp, bp = lin(ks[0], ks[1], latent_size, proj_dim)
    wpt, bpt = wp, bp                 # projector_target = deepcopy(projector)
    w1, b1 = lin(ks[2], ks[3], proj_dim, anchor_hidden_size)
    w2, b2 = lin(ks[4], ks[5], anchor_hidden_size, proj_dim)
    ww, _ = lin(ks[6], ks[7], proj_dim, proj_dim, bias=False)
    return dict(wp=wp, bp=bp, wpt=wpt, bpt=bpt,
                w1=w1, b1=b1, w2=w2, b2=b2, ww=ww)


def prepare_params(params):
    """One-time weight prep (hoisted out of the per-call wrapper): pad the MLP
    hidden dim to a 128 multiple and cast matmul weights to bf16.  Biases stay
    f32 (added after f32 accumulation)."""
    H = params["w1"].shape[1]
    Hp = _round_up(H, 128)
    bf = jnp.bfloat16
    return dict(
        wp=params["wp"].astype(bf),
        bp=params["bp"],
        wpt=params["wpt"].astype(bf),
        bpt=params["bpt"],
        w1=jnp.pad(params["w1"], ((0, 0), (0, Hp - H))).astype(bf),
        b1=jnp.pad(params["b1"], ((0, 0), (0, Hp - H))),
        w2=jnp.pad(params["w2"], ((0, Hp - H), (0, 0))).astype(bf),
        b2=params["b2"],
        ww=params["ww"].astype(bf),
    )


def reference_forward_f32(anchor, positive, params):
    """Pure-f32 reference (PyTorch semantics)."""
    a = anchor @ params["wp"] + params["bp"]
    p = positive @ params["wpt"] + params["bpt"]
    h = jnp.maximum(a @ params["w1"] + params["b1"], 0.0)
    a = a + (h @ params["w2"] + params["b2"])
    pred = a @ params["ww"]
    logits = pred @ p.T
    logits = logits - jnp.max(logits, axis=1, keepdims=True)
    return logits, a, p


def reference_forward_bf16(anchor, positive, params):
    """Matched-precision reference: bf16 matmul operands, f32 accumulation."""
    bf = jnp.bfloat16
    dot = lambda x, w: jnp.dot(x.astype(bf), w.astype(bf),
                               preferred_element_type=jnp.float32)
    a = dot(anchor, params["wp"]) + params["bp"]
    p = dot(positive, params["wpt"]) + params["bpt"]
    h = jnp.maximum(dot(a, params["w1"]) + params["b1"], 0.0)
    a = a + (dot(h, params["w2"]) + params["b2"])
    pred = dot(a, params["ww"])
    logits = lax.dot_general(pred.astype(bf), p.astype(bf),
                             dimension_numbers=(((1,), (1,)), ((), ())),
                             preferred_element_type=jnp.float32)
    logits = logits - jnp.max(logits, axis=1, keepdims=True)
    return logits, a, p


if __name__ == "__main__":
    B = 8
    latent_size = 32
    anchor_hidden_size = 64

    key = jax.random.PRNGKey(0)
    k_anchor, k_positive, k_params = jax.random.split(key, 3)

    anchor = jax.random.normal(k_anchor, (B, latent_size), jnp.float32)
    positive = jax.random.normal(k_positive, (B, latent_size), jnp.float32)
    params = init_params(k_params, latent_size, anchor_hidden_size)
    prepared = jax.block_until_ready(prepare_params(params))   # one-time prep

    # Fused path (projector_target is an exact copy of projector at init).
    logits, a_out, p_out = jax.block_until_ready(
        contrast_forward(anchor, positive, prepared, shared_target=True))

    # General two-weight path (what you'd use after momentum updates).
    logits2, a_out2, p_out2 = jax.block_until_ready(
        contrast_forward(anchor, positive, prepared, shared_target=False))

    # 1) Check against the matched-precision (bf16 matmul, f32 accum) reference.
    l_ref, a_ref, p_ref = reference_forward_bf16(anchor, positive, params)
    for got, ref in ((logits, l_ref), (a_out, a_ref), (p_out, p_ref),
                     (logits2, l_ref), (a_out2, a_ref), (p_out2, p_ref)):
        assert jnp.allclose(got, ref, atol=5e-3, rtol=5e-3)

    # 2) Loose check against the pure-f32 PyTorch-semantics reference
    #    (bf16 matmuls introduce ~1% relative drift).
    l32, a32, p32 = reference_forward_f32(anchor, positive, params)
    assert jnp.allclose(logits, l32, atol=5e-1, rtol=5e-2)
    assert jnp.allclose(a_out, a32, atol=1e-1, rtol=5e-2)
    assert jnp.allclose(p_out, p32, atol=1e-1, rtol=5e-2)

    print("KERNEL_OK")
</pallas_src>

<mosaic_0001>
module attributes {stable_mosaic.version = 11 : i64} {
  func.func @_contrast_kernel_shared(%arg0: i32, %arg1: memref<16x32xf32, #tpu.memory_space<vmem>>, %arg2: memref<128x32xf32, #tpu.memory_space<vmem>>, %arg3: memref<1x128xf32, #tpu.memory_space<vmem>>, %arg4: memref<32x256xbf16, #tpu.memory_space<vmem>>, %arg5: memref<1x256xf32, #tpu.memory_space<vmem>>, %arg6: memref<256x128xbf16, #tpu.memory_space<vmem>>, %arg7: memref<1x128xf32, #tpu.memory_space<vmem>>, %arg8: memref<128x256xbf16, #tpu.memory_space<vmem>>, %arg9: memref<1x256xf32, #tpu.memory_space<vmem>>, %arg10: memref<256x256xbf16, #tpu.memory_space<vmem>>, %arg11: memref<16x128xf32, #tpu.memory_space<vmem>>, %arg12: memref<16x256xf32, #tpu.memory_space<vmem>>, %arg13: memref<128x256xf32, #tpu.memory_space<vmem>>) attributes {dimension_semantics = [#tpu.dimension_semantics<parallel>], iteration_bounds = array<i64: 1>, scalar_prefetch = 0 : i64, scratch_operands = 0 : i64, tpu.core_type = #tpu.core_type<tc>, window_params = [{transform_indices = @transform_0, window_bounds = array<i64: 16, 32>}, {pipeline_mode = #tpu.pipeline_mode<synchronous>, transform_indices = @transform_1, window_bounds = array<i64: 128, 32>}, {pipeline_mode = #tpu.pipeline_mode<synchronous>, transform_indices = @transform_2, window_bounds = array<i64: 1, 128>}, {pipeline_mode = #tpu.pipeline_mode<synchronous>, transform_indices = @transform_3, window_bounds = array<i64: 32, 256>}, {pipeline_mode = #tpu.pipeline_mode<synchronous>, transform_indices = @transform_4, window_bounds = array<i64: 1, 256>}, {pipeline_mode = #tpu.pipeline_mode<synchronous>, transform_indices = @transform_5, window_bounds = array<i64: 256, 128>}, {pipeline_mode = #tpu.pipeline_mode<synchronous>, transform_indices = @transform_6, window_bounds = array<i64: 1, 128>}, {pipeline_mode = #tpu.pipeline_mode<synchronous>, transform_indices = @transform_7, window_bounds = array<i64: 128, 256>}, {pipeline_mode = #tpu.pipeline_mode<synchronous>, transform_indices = @transform_8, window_bounds = array<i64: 1, 256>}, {pipeline_mode = #tpu.pipeline_mode<synchronous>, transform_indices = @transform_9, window_bounds = array<i64: 256, 256>}, {transform_indices = @transform_10, window_bounds = array<i64: 16, 128>}, {transform_indices = @transform_11, window_bounds = array<i64: 16, 256>}, {pipeline_mode = #tpu.pipeline_mode<synchronous>, transform_indices = @transform_12, window_bounds = array<i64: 128, 256>}]} {
    %c0 = arith.constant 0 : index
    %c0_0 = arith.constant 0 : index
    %0 = vector.load %arg2[%c0, %c0_0] : memref<128x32xf32, #tpu.memory_space<vmem>>, vector<128x32xf32>
    %1 = arith.truncf %0 : vector<128x32xf32> to vector<128x32xbf16>
    %c0_1 = arith.constant 0 : index
    %c0_2 = arith.constant 0 : index
    %2 = vector.load %arg4[%c0_1, %c0_2] : memref<32x256xbf16, #tpu.memory_space<vmem>>, vector<32x256xbf16>
    %cst = arith.constant dense<0.000000e+00> : vector<128x256xf32>
    %3 = tpu.matmul %1, %2, %cst {dimension_numbers = #tpu.dot_dimension_numbers<[1], [0], [0], [1], [0, 0, 1, 1], [], []>} : vector<128x32xbf16>, vector<32x256xbf16>, vector<128x256xf32> -> vector<128x256xf32>
    %c0_3 = arith.constant 0 : index
    %c0_4 = arith.constant 0 : index
    %4 = vector.load %arg5[%c0_3, %c0_4] : memref<1x256xf32, #tpu.memory_space<vmem>>, vector<1x256xf32>
    %5 = vector.broadcast %4 : vector<1x256xf32> to vector<128x256xf32>
    %6 = arith.addf %3, %5 : vector<128x256xf32>
    %c0_5 = arith.constant 0 : index
    %c0_6 = arith.constant 0 : index
    %7 = vector.load %arg1[%c0_5, %c0_6] : memref<16x32xf32, #tpu.memory_space<vmem>>, vector<16x32xf32>
    %8 = arith.truncf %7 : vector<16x32xf32> to vector<16x32xbf16>
    %c0_7 = arith.constant 0 : index
    %c0_8 = arith.constant 0 : index
    %9 = vector.load %arg4[%c0_7, %c0_8] : memref<32x256xbf16, #tpu.memory_space<vmem>>, vector<32x256xbf16>
    %cst_9 = arith.constant dense<0.000000e+00> : vector<16x256xf32>
    %10 = tpu.matmul %8, %9, %cst_9 {dimension_numbers = #tpu.dot_dimension_numbers<[1], [0], [0], [1], [0, 0, 1, 1], [], []>} : vector<16x32xbf16>, vector<32x256xbf16>, vector<16x256xf32> -> vector<16x256xf32>
    %c0_10 = arith.constant 0 : index
    %c0_11 = arith.constant 0 : index
    %11 = vector.load %arg5[%c0_10, %c0_11] : memref<1x256xf32, #tpu.memory_space<vmem>>, vector<1x256xf32>
    %12 = vector.broadcast %11 : vector<1x256xf32> to vector<16x256xf32>
    %13 = arith.addf %10, %12 : vector<16x256xf32>
    %14 = arith.truncf %13 : vector<16x256xf32> to vector<16x256xbf16>
    %c0_12 = arith.constant 0 : index
    %c0_13 = arith.constant 0 : index
    %15 = vector.load %arg6[%c0_12, %c0_13] : memref<256x128xbf16, #tpu.memory_space<vmem>>, vector<256x128xbf16>
    %cst_14 = arith.constant dense<0.000000e+00> : vector<16x128xf32>
    %16 = tpu.matmul %14, %15, %cst_14 {dimension_numbers = #tpu.dot_dimension_numbers<[1], [0], [0], [1], [0, 0, 1, 1], [], []>} : vector<16x256xbf16>, vector<256x128xbf16>, vector<16x128xf32> -> vector<16x128xf32>
    %c0_15 = arith.constant 0 : index
    %c0_16 = arith.constant 0 : index
    %17 = vector.load %arg7[%c0_15, %c0_16] : memref<1x128xf32, #tpu.memory_space<vmem>>, vector<1x128xf32>
    %18 = vector.broadcast %17 : vector<1x128xf32> to vector<16x128xf32>
    %19 = arith.addf %16, %18 : vector<16x128xf32>
    %cst_17 = arith.constant 0.000000e+00 : f32
    %20 = vector.broadcast %cst_17 : f32 to vector<16x128xf32>
    %21 = arith.maximumf %19, %20 : vector<16x128xf32>
    %22 = arith.truncf %21 : vector<16x128xf32> to vector<16x128xbf16>
    %c0_18 = arith.constant 0 : index
    %c0_19 = arith.constant 0 : index
    %23 = vector.load %arg8[%c0_18, %c0_19] : memref<128x256xbf16, #tpu.memory_space<vmem>>, vector<128x256xbf16>
    %cst_20 = arith.constant dense<0.000000e+00> : vector<16x256xf32>
    %24 = tpu.matmul %22, %23, %cst_20 {dimension_numbers = #tpu.dot_dimension_numbers<[1], [0], [0], [1], [0, 0, 1, 1], [], []>} : vector<16x128xbf16>, vector<128x256xbf16>, vector<16x256xf32> -> vector<16x256xf32>
    %c0_21 = arith.constant 0 : index
    %c0_22 = arith.constant 0 : index
    %25 = vector.load %arg9[%c0_21, %c0_22] : memref<1x256xf32, #tpu.memory_space<vmem>>, vector<1x256xf32>
    %26 = vector.broadcast %25 : vector<1x256xf32> to vector<16x256xf32>
    %27 = arith.addf %24, %26 : vector<16x256xf32>
    %28 = arith.addf %13, %27 : vector<16x256xf32>
    %29 = arith.truncf %28 : vector<16x256xf32> to vector<16x256xbf16>
    %c0_23 = arith.constant 0 : index
    %c0_24 = arith.constant 0 : index
    %30 = vector.load %arg10[%c0_23, %c0_24] : memref<256x256xbf16, #tpu.memory_space<vmem>>, vector<256x256xbf16>
    %cst_25 = arith.constant dense<0.000000e+00> : vector<16x256xf32>
    %31 = tpu.matmul %29, %30, %cst_25 {dimension_numbers = #tpu.dot_dimension_numbers<[1], [0], [0], [1], [0, 0, 1, 1], [], []>} : vector<16x256xbf16>, vector<256x256xbf16>, vector<16x256xf32> -> vector<16x256xf32>
    %32 = arith.truncf %31 : vector<16x256xf32> to vector<16x256xbf16>
    %33 = arith.truncf %6 : vector<128x256xf32> to vector<128x256xbf16>
    %cst_26 = arith.constant dense<0.000000e+00> : vector<16x128xf32>
    %34 = tpu.matmul %32, %33, %cst_26 {dimension_numbers = #tpu.dot_dimension_numbers<[1], [1], [0], [0], [0, 0, 1, 0], [], []>} : vector<16x256xbf16>, vector<128x256xbf16>, vector<16x128xf32> -> vector<16x128xf32>
    %c0_27 = arith.constant 0 : index
    %c0_28 = arith.constant 0 : index
    %35 = vector.load %arg3[%c0_27, %c0_28] : memref<1x128xf32, #tpu.memory_space<vmem>>, vector<1x128xf32>
    %36 = vector.broadcast %35 : vector<1x128xf32> to vector<16x128xf32>
    %37 = arith.addf %34, %36 : vector<16x128xf32>
    %cst_29 = arith.constant dense<0xFF800000> : vector<16xf32>
    %38 = vector.multi_reduction <maximumf>, %37, %cst_29 [1] : vector<16x128xf32> to vector<16xf32>
    %39 = vector.shape_cast %38 : vector<16xf32> to vector<16x1xf32>
    %40 = vector.broadcast %39 : vector<16x1xf32> to vector<16x128xf32>
    %41 = arith.subf %37, %40 : vector<16x128xf32>
    %c0_30 = arith.constant 0 : index
    %c0_31 = arith.constant 0 : index
    %42 = vector.load %arg11[%c0_30, %c0_31] : memref<16x128xf32, #tpu.memory_space<vmem>>, vector<16x128xf32>
    tpu.vector_store %arg11[%c0_30, %c0_31], %41 {strides = array<i32>} : memref<16x128xf32, #tpu.memory_space<vmem>>, vector<16x128xf32>,
    %c0_32 = arith.constant 0 : index
    %c0_33 = arith.constant 0 : index
    %43 = vector.load %arg12[%c0_32, %c0_33] : memref<16x256xf32, #tpu.memory_space<vmem>>, vector<16x256xf32>
    tpu.vector_store %arg12[%c0_32, %c0_33], %28 {strides = array<i32>} : memref<16x256xf32, #tpu.memory_space<vmem>>, vector<16x256xf32>,
    %c0_34 = arith.constant 0 : index
    %c0_35 = arith.constant 0 : index
    %44 = vector.load %arg13[%c0_34, %c0_35] : memref<128x256xf32, #tpu.memory_space<vmem>>, vector<128x256xf32>
    tpu.vector_store %arg13[%c0_34, %c0_35], %6 {strides = array<i32>} : memref<128x256xf32, #tpu.memory_space<vmem>>, vector<128x256xf32>,
    return
  }
  func.func @transform_0(%arg0: i32) -> (i32, i32) {
    %c0_i32 = arith.constant 0 : i32
    %c0_i32_0 = arith.constant 0 : i32
    return %arg0, %c0_i32 : i32, i32
  }
  func.func @transform_1(%arg0: i32) -> (i32, i32) {
    %c0_i32 = arith.constant 0 : i32
    %c0_i32_0 = arith.constant 0 : i32
    %c0_i32_1 = arith.constant 0 : i32
    return %c0_i32, %c0_i32_0 : i32, i32
  }
  func.func @transform_2(%arg0: i32) -> (i32, i32) {
    %c0_i32 = arith.constant 0 : i32
    %c0_i32_0 = arith.constant 0 : i32
    %c0_i32_1 = arith.constant 0 : i32
    return %c0_i32, %c0_i32_0 : i32, i32
  }
  func.func @transform_3(%arg0: i32) -> (i32, i32) {
    %c0_i32 = arith.constant 0 : i32
    %c0_i32_0 = arith.constant 0 : i32
    %c0_i32_1 = arith.constant 0 : i32
    return %c0_i32, %c0_i32_0 : i32, i32
  }
  func.func @transform_4(%arg0: i32) -> (i32, i32) {
    %c0_i32 = arith.constant 0 : i32
    %c0_i32_0 = arith.constant 0 : i32
    %c0_i32_1 = arith.constant 0 : i32
    return %c0_i32, %c0_i32_0 : i32, i32
  }
  func.func @transform_5(%arg0: i32) -> (i32, i32) {
    %c0_i32 = arith.constant 0 : i32
    %c0_i32_0 = arith.constant 0 : i32
    %c0_i32_1 = arith.constant 0 : i32
    return %c0_i32, %c0_i32_0 : i32, i32
  }
  func.func @transform_6(%arg0: i32) -> (i32, i32) {
    %c0_i32 = arith.constant 0 : i32
    %c0_i32_0 = arith.constant 0 : i32
    %c0_i32_1 = arith.constant 0 : i32
    return %c0_i32, %c0_i32_0 : i32, i32
  }
  func.func @transform_7(%arg0: i32) -> (i32, i32) {
    %c0_i32 = arith.constant 0 : i32
    %c0_i32_0 = arith.constant 0 : i32
    %c0_i32_1 = arith.constant 0 : i32
    return %c0_i32, %c0_i32_0 : i32, i32
  }
  func.func @transform_8(%arg0: i32) -> (i32, i32) {
    %c0_i32 = arith.constant 0 : i32
    %c0_i32_0 = arith.constant 0 : i32
    %c0_i32_1 = arith.constant 0 : i32
    return %c0_i32, %c0_i32_0 : i32, i32
  }
  func.func @transform_9(%arg0: i32) -> (i32, i32) {
    %c0_i32 = arith.constant 0 : i32
    %c0_i32_0 = arith.constant 0 : i32
    %c0_i32_1 = arith.constant 0 : i32
    return %c0_i32, %c0_i32_0 : i32, i32
  }
  func.func @transform_10(%arg0: i32) -> (i32, i32) {
    %c0_i32 = arith.constant 0 : i32
    %c0_i32_0 = arith.constant 0 : i32
    return %arg0, %c0_i32 : i32, i32
  }
  func.func @transform_11(%arg0: i32) -> (i32, i32) {
    %c0_i32 = arith.constant 0 : i32
    %c0_i32_0 = arith.constant 0 : i32
    return %arg0, %c0_i32 : i32, i32
  }
  func.func @transform_12(%arg0: i32) -> (i32, i32) {
    %c0_i32 = arith.constant 0 : i32
    %c0_i32_0 = arith.constant 0 : i32
    %c0_i32_1 = arith.constant 0 : i32
    return %c0_i32, %c0_i32_0 : i32, i32
  }
}

</mosaic_0001>

<bundles_post_ra>
// kernel: contrast_forward.1
= control target key start
LH: loop header
LB: loop body
LE: loop exit
PB: predicated region body
PF: predicated region fallthrough
CT: control target
= control target key end

     0   :  { %18 = vsyncpa [#allocation3], 0  ;;  %s1849_s0 = inlined_call_operand.vmem [shape: f32[16,32], index: 0, kind: input, shape index: {}]   ;;  %s1850_s1 = inlined_call_operand.vmem [shape: f32[128,32], index: 1, kind: input, shape index: {}]   ;;  %s1851_s2 = inlined_call_operand.vmem [shape: f32[1,128], index: 2, kind: input, shape index: {}]   ;;  %s1852_s3 = inlined_call_operand.vmem [shape: bf16[32,256], index: 3, kind: input, shape index: {}]   ;;  %s1853_s4 = inlined_call_operand.vmem [shape: f32[1,256], index: 4, kind: input, shape index: {}]   ;;  %s1854_s5 = inlined_call_operand.vmem [shape: bf16[256,128], index: 5, kind: input, shape index: {}]   ;;  %s1855_s6 = inlined_call_operand.vmem [shape: f32[1,128], index: 6, kind: input, shape index: {}]   ;;  %s1856_s7 = inlined_call_operand.hbm [shape: bf16[128,256], index: 7, kind: input, shape index: {}]   ;;  %s1857_s8 = inlined_call_operand.vmem [shape: f32[1,256], index: 8, kind: input, shape index: {}]   ;;  %s1858_s9 = inlined_call_operand.hbm [shape: bf16[256,256], index: 9, kind: input, shape index: {}]   ;;  %s1859_s10 = inlined_call_operand.vmem [shape: f32[16,128], index: 10, kind: output, shape index: {0}]   ;;  %s1860_s11 = inlined_call_operand.vmem [shape: f32[16,256], index: 11, kind: output, shape index: {1}]   ;;  %s1861_s12 = inlined_call_operand.vmem [shape: f32[128,256], index: 12, kind: output, shape index: {2}]  }
   0x1   :  { %19 = vsyncpa [#allocation5], 0  ;;  %s1263_s21 = smov [#allocation2]   ;;  %s1215_s25 = scalar_lea.hbm %s1856_s7, 2048 }
   0x2   :  { %s39_s22 = sshll.u32 %s1263_s21, 4  ;;  %p1216_p0 = scmp.ne.s32.totalorder %s1856_s7, %s1215_s25  ;;  %s40_s22 = int_to_ptr.vmem [resolvable:$true] %s39_s22 }
   0x3   :  { %p1219_p1 = scmp.lt.u32.totalorder %s1215_s25, %s1856_s7 }
   0x5   :  { %p1221_p2 = pnand %p1219_p1, %p1216_p0 }
   0x7   :  { %1224 = shalt.err (!%p1221_p2)
}
   0x8   :  { %s1225_s30 = scalar_lea.vmem %s40_s22, 2048  ;;  %p1230_p4 = scmp.lt.s32.totalorder %s40_s22, %s40_s22 }
   0x9   :  { %p1226_p3 = scmp.ne.s32.totalorder %s40_s22, %s1225_s30  ;;  %p1231_p5 = scmp.lt.s32.totalorder %s1225_s30, %s1225_s30 }
   0xb   :  { %p1232_p6 = por %p1231_p5, %p1230_p4 }
   0xd   :  { %p1233_p7 = pnand %p1232_p6, %p1226_p3 }
   0xf   :  { %1236 = shalt.err (!%p1233_p7)
}
  0x10   :  { %s1264_s13 = smov 128   ;;  %s1265_s14 = smov 8  }
  0x11   :  { %45 = dma.hbm_to_vmem [thread:$0]  %s1856_s7, 2048, %s40_s22, [#allocation3], %s1264_s13, %s1264_s13, %s1265_s14  }
  0x12   :  { %s1266_s17 = smov [#allocation4]   ;;  %s1237_s21 = scalar_lea.hbm %s1858_s9, 4096 }
  0x13   :  { %s53_s18 = sshll.u32 %s1266_s17, 4  ;;  %p1238_p8 = scmp.ne.s32.totalorder %s1858_s9, %s1237_s21  ;;  %s54_s18 = int_to_ptr.vmem [resolvable:$true] %s53_s18 }
  0x14   :  { %p1241_p9 = scmp.lt.u32.totalorder %s1237_s21, %s1858_s9 }
  0x16   :  { %p1243_p10 = pnand %p1241_p9, %p1238_p8 }
  0x18   :  { %1246 = shalt.err (!%p1243_p10)
}
  0x19   :  { %s1247_s27 = scalar_lea.vmem %s54_s18, 4096  ;;  %p1252_p12 = scmp.lt.s32.totalorder %s54_s18, %s54_s18 }
  0x1a   :  { %p1248_p11 = scmp.ne.s32.totalorder %s54_s18, %s1247_s27  ;;  %p1253_p13 = scmp.lt.s32.totalorder %s1247_s27, %s1247_s27 }
  0x1c   :  { %p1254_p0 = por %p1253_p13, %p1252_p12 }
  0x1e   :  { %p1255_p1 = pnand %p1254_p0, %p1248_p11 }
  0x20   :  { %1258 = shalt.err (!%p1255_p1)
}
  0x21   :  { %59 = dma.hbm_to_vmem [thread:$0]  %s1858_s9, 4096, %s54_s18, [#allocation5], %s1264_s13, %s1264_s13, %s1265_s14  }
  0x22   :  { %1259 = dma.done.wait [#allocation3], 2048  }
  0x23   :  { %1260 = vsyncadd [#allocation3], 4294965248 }
  0x24   :  { %1261 = dma.done.wait [#allocation5], 4096  }
  0x25   :  { %1262 = vsyncadd [#allocation5], 4294963200  ;;  %v1267_v0 = vmov 0   ;;  %v1121_v1 = vld [vmem:[%s1852_s3 + $0x4] ss:$8 sps:$4 sm:$0xff]   ;;  %vm127_vm0 = vcmask 261120   ;;  %v97_v62 = vlaneseq }
  0x26   :  { %244 = vmatprep.mubr.bf16.mxu1 %v1267_v0  ;;  %184 = vmatprep.mubr.bf16.mxu0 %v1267_v0  ;;  %v1123_v2 = vld [vmem:[%s1852_s3] ss:$8 sps:$4 sm:$0xff]   ;;  %v1124_v3 = vld [vmem:[%s1852_s3 + $0x14] ss:$8 sps:$4 sm:$0xff]   ;;  %v1126_v4 = vld [vmem:[%s1852_s3 + $0x10] ss:$8 sps:$4 sm:$0xff]  }
  0x27   :  { %1112 = vmatprep.subr.bf16.mxu1 %v1121_v1  ;;  %152 = vmatprep.subr.bf16.mxu0 %v1121_v1  ;;  %v79_v5 = vld [vmem:[%s1850_s1 + $0x60] sm:$0xff]  ;;  %v80_v6 = vld [vmem:[%s1850_s1 + $0x68] sm:$0xff]  ;;  %v81_v8 = vld [vmem:[%s1850_s1 + $0x70] sm:$0xff]  ;;  %v1490_v63 = vshrl.u32 %v97_v62, 7 }
  0x28   :  { %1114 = vmatpush1.bf16.msra.mxu1 %v1123_v2  ;;  %153 = vmatpush1.bf16.msra.mxu0 %v1123_v2  ;;  %v89_v7 = vpack.c.bf16 %v80_v6, %v79_v5  ;;  %v82_v9 = vld [vmem:[%s1850_s1 + $0x78] sm:$0xff]  ;;  %v1127_v10 = vld [vmem:[%s1854_s5 + $0x40] sm:$0xff]   ;;  %v266_v13 = vld [vmem:[%s1849_s0 + $0x8] sm:$0xff] }
  0x29   :  { %1113 = vmatprep.subr.bf16.mxu1 %v1124_v3  ;;  %154 = vmatprep.subr.bf16.mxu0 %v1124_v3  ;;  %v90_v11 = vpack.c.bf16 %v82_v9, %v81_v8  ;;  %v265_v12 = vld [vmem:[%s1849_s0] sm:$0xff]  ;;  %v1129_v16 = vld [vmem:[%s1854_s5 + $0x48] sm:$0xff]   ;;  %v1131_v18 = vld [vmem:[%s1854_s5 + $0x50] sm:$0xff]  }
  0x2a   :  { %v1128_v14 = vld [vmem:[%s1854_s5] sm:$0xff]   ;;  %v267_v15 = vpack.c.bf16 %v266_v13, %v265_v12  ;;  %v1130_v17 = vld [vmem:[%s1854_s5 + $0x8] sm:$0xff]   ;;  %v1132_v19 = vld [vmem:[%s1854_s5 + $0x10] sm:$0xff]  }
  0x2b   :  { %v1133_v20 = vld [vmem:[%s1854_s5 + $0x58] sm:$0xff]   ;;  %v1135_v22 = vld [vmem:[%s1854_s5 + $0x60] sm:$0xff]   ;;  %v1137_v24 = vld [vmem:[%s1854_s5 + $0x68] sm:$0xff]  }
  0x2c   :  { %1115 = vmatpush1.bf16.msra.mxu1 %v1126_v4  ;;  %155 = vmatpush1.bf16.msra.mxu0 %v1126_v4  ;;  %v1134_v21 = vld [vmem:[%s1854_s5 + $0x18] sm:$0xff]   ;;  %v1136_v23 = vld [vmem:[%s1854_s5 + $0x20] sm:$0xff]   ;;  %v1138_v25 = vld [vmem:[%s1854_s5 + $0x28] sm:$0xff]  }
  0x2d   :  { %271 = vmatprep.subr.bf16.mxu1 %v1121_v1  ;;  %v1139_v26 = vld [vmem:[%s1854_s5 + $0x70] sm:$0xff]   ;;  %v1141_v28 = vld [vmem:[%s1854_s5 + $0x78] sm:$0xff]   ;;  %v67_v30 = vld [vmem:[%s1850_s1] sm:$0xff]  ;;  %v1863_v1 = vsub.s32 0, %v1490_v63 }
  0x2e   :  { %v1140_v27 = vld [vmem:[%s1854_s5 + $0x30] sm:$0xff]   ;;  %v1142_v29 = vld [vmem:[%s1854_s5 + $0x38] sm:$0xff]   ;;  %v68_v31 = vld [vmem:[%s1850_s1 + $0x8] sm:$0xff] }
  0x2f   :  { %1021 = vmatmul.mubr.msk.bf16.vlgmr.msra.gmra.mrb[0].mxu1 %vm127_vm0, %v89_v7  ;;  %v83_v32 = vpack.c.bf16 %v68_v31, %v67_v30  ;;  %v69_v33 = vld [vmem:[%s1850_s1 + $0x10] sm:$0xff]  ;;  %v70_v34 = vld [vmem:[%s1850_s1 + $0x18] sm:$0xff]  ;;  %v1143_v35 = vld [vmem:[#allocation2] ss:$8 sps:$4 sm:$0xff]  }
  0x30   :  { %272 = vmatpush1.bf16.msra.mxu1 %v1123_v2  ;;  %254 = vmatprep.mubr.bf16.mxu1 %v1267_v0  ;;  %v1145_v36 = vld [vmem:[#allocation2 + $0x4] ss:$8 sps:$4 sm:$0xff]   ;;  %v1148_v37 = vld [vmem:[#allocation2 + $0x14] ss:$8 sps:$4 sm:$0xff]   ;;  %v84_v38 = vpack.c.bf16 %v70_v34, %v69_v33  ;;  %v1146_v39 = vld [vmem:[#allocation2 + $0x10] ss:$8 sps:$4 sm:$0xff]  }
  0x31   :  { %273 = vmatprep.subr.bf16.mxu1 %v1124_v3  ;;  %1015 = vmatmul.mubr.msk.bf16.vlgmr.msra.gmra.mrb[0].mxu0 %vm127_vm0, %v83_v32  ;;  %v1151_v40 = vld [vmem:[#allocation2 + $0x24] ss:$8 sps:$4 sm:$0xff]   ;;  %v1149_v43 = vld [vmem:[#allocation2 + $0x20] ss:$8 sps:$4 sm:$0xff]   ;;  %v1154_v44 = vld [vmem:[#allocation2 + $0x34] ss:$8 sps:$4 sm:$0xff]  }
  0x32   :  { %194 = vmatprep.mubr.bf16.mxu0 %v1267_v0  ;;  %603 = vmatprep.subr.bf16.mxu0 %v1145_v36  ;;  %v71_v41 = vld [vmem:[%s1850_s1 + $0x20] sm:$0xff]  ;;  %v72_v42 = vld [vmem:[%s1850_s1 + $0x28] sm:$0xff]  ;;  %v1152_v46 = vld [vmem:[#allocation2 + $0x30] ss:$8 sps:$4 sm:$0xff]   ;;  %v1862_v3 = vsub.s32 1, %v1490_v63 }
  0x33   :  { %604 = vmatpush1.bf16.msra.mxu0 %v1143_v35  ;;  %v85_v45 = vpack.c.bf16 %v72_v42, %v71_v41  ;;  %v1157_v47 = vld [vmem:[#allocation2 + $0x44] ss:$8 sps:$4 sm:$0xff]   ;;  %v73_v48 = vld [vmem:[%s1850_s1 + $0x30] sm:$0xff]  ;;  %v74_v49 = vld [vmem:[%s1850_s1 + $0x38] sm:$0xff] }
  0x34   :  { %274 = vmatpush1.bf16.msra.mxu1 %v1126_v4  ;;  %605 = vmatprep.subr.bf16.mxu0 %v1148_v37  ;;  %v1155_v50 = vld [vmem:[#allocation2 + $0x40] ss:$8 sps:$4 sm:$0xff]   ;;  %v1160_v51 = vld [vmem:[#allocation2 + $0x54] ss:$8 sps:$4 sm:$0xff]   ;;  %v86_v52 = vpack.c.bf16 %v74_v49, %v73_v48  ;;  %v1158_v53 = vld [vmem:[#allocation2 + $0x50] ss:$8 sps:$4 sm:$0xff]  }
  0x35   :  { %1090 = vmatprep.subr.bf16.mxu1 %v1127_v10  ;;  %v1163_v54 = vld [vmem:[#allocation2 + $0x64] ss:$8 sps:$4 sm:$0xff]   ;;  %v1161_v57 = vld [vmem:[#allocation2 + $0x60] ss:$8 sps:$4 sm:$0xff]   ;;  %v77_v59 = vld [vmem:[%s1850_s1 + $0x50] sm:$0xff] }
  0x36   :  { %v75_v55 = vld [vmem:[%s1850_s1 + $0x40] sm:$0xff]  ;;  %v76_v56 = vld [vmem:[%s1850_s1 + $0x48] sm:$0xff]  ;;  %v78_v60 = vld [vmem:[%s1850_s1 + $0x58] sm:$0xff] }
  0x37   :  { %1022 = vmatmul.mubr.msk.bf16.gmra.mrb[4].mxu1 %vm127_vm0, %v90_v11  ;;  %606 = vmatpush1.bf16.msra.mxu0 %v1146_v39  ;;  %v87_v58 = vpack.c.bf16 %v76_v56, %v75_v55  ;;  %v88_v61 = vpack.c.bf16 %v78_v60, %v77_v59  ;;  %v95_v2 = vld [vmem:[%s1853_s4] sm:$0x3]  ;;  %v1166_v35 = vld [vmem:[#allocation2 + $0x74] ss:$8 sps:$4 sm:$0xff]   ;;  %v1164_v36 = vld [vmem:[#allocation2 + $0x70] ss:$8 sps:$4 sm:$0xff]  }
  0x38   :  { %303 = vmatprep.mubr.bf16.mxu1 %v1267_v0  ;;  %607 = vmatprep.subr.bf16.mxu0 %v1151_v40  ;;  %v1499_v4 = vrot.slane %v95_v2, %v1863_v1  ;;  %v1503_v5 = vrot.slane %v95_v2, %v1862_v3 }
  0x39   :  { %1016 = vmatmul.mubr.msk.bf16.gmra.mrb[4].mxu0 %vm127_vm0, %v84_v38 }
  0x3a   :  { %204 = vmatprep.mubr.bf16.mxu0 %v1267_v0 }
  0x3b   :  { %608 = vmatpush1.bf16.msra.mxu0 %v1149_v43 }
  0x3c   :  { %609 = vmatprep.subr.bf16.mxu0 %v1154_v44 }
  0x3f   :  { %1023 = vmatmul.mubr.msk.bf16.vlgmr.msra.gmra.mrb[8].mxu1 %vm127_vm0, %v267_v15  ;;  %610 = vmatpush1.bf16.msra.mxu0 %v1152_v46 }
  0x40   :  { %1091 = vmatpush3.bf16.msra.mxu1 %v1128_v14  ;;  %611 = vmatprep.subr.bf16.mxu0 %v1157_v47 }
  0x41   :  { %1092 = vmatprep.subr.bf16.mxu1 %v1129_v16  ;;  %1017 = vmatmul.mubr.msk.bf16.gmra.mrb[8].mxu0 %vm127_vm0, %v85_v45 }
  0x42   :  { %214 = vmatprep.mubr.bf16.mxu0 %v1267_v0 }
  0x43   :  { %612 = vmatpush1.bf16.msra.mxu0 %v1155_v50 }
  0x44   :  { %1093 = vmatpush3.bf16.msra.mxu1 %v1130_v17  ;;  %613 = vmatprep.subr.bf16.mxu0 %v1160_v51 }
  0x45   :  { %1094 = vmatprep.subr.bf16.mxu1 %v1131_v18 }
  0x47   :  { %614 = vmatpush1.bf16.msra.mxu0 %v1158_v53 }
  0x48   :  { %1095 = vmatpush3.bf16.msra.mxu1 %v1132_v19  ;;  %615 = vmatprep.subr.bf16.mxu0 %v1163_v54 }
  0x49   :  { %1096 = vmatprep.subr.bf16.mxu1 %v1133_v20  ;;  %1018 = vmatmul.mubr.msk.bf16.gmra.mrb[12].mxu0 %vm127_vm0, %v86_v52 }
  0x4a   :  { %224 = vmatprep.mubr.bf16.mxu0 %v1267_v0 }
  0x4b   :  { %616 = vmatpush1.bf16.msra.mxu0 %v1161_v57 }
  0x4c   :  { %1097 = vmatpush3.bf16.msra.mxu1 %v1134_v21  ;;  %617 = vmatprep.subr.bf16.mxu0 %v1166_v35 }
  0x4d   :  { %1098 = vmatprep.subr.bf16.mxu1 %v1135_v22 }
  0x4f   :  { %618 = vmatpush1.bf16.msra.mxu0 %v1164_v36 }
  0x50   :  { %1099 = vmatpush3.bf16.msra.mxu1 %v1136_v23 }
  0x51   :  { %1100 = vmatprep.subr.bf16.mxu1 %v1137_v24  ;;  %1019 = vmatmul.mubr.msk.bf16.gmra.mrb[16].mxu0 %vm127_vm0, %v87_v58 }
  0x52   :  { %234 = vmatprep.mubr.bf16.mxu0 %v1267_v0 }
  0x54   :  { %1101 = vmatpush3.bf16.msra.mxu1 %v1138_v25 }
  0x55   :  { %1102 = vmatprep.subr.bf16.mxu1 %v1139_v26 }
  0x58   :  { %1103 = vmatpush3.bf16.msra.mxu1 %v1140_v27 }
  0x59   :  { %1104 = vmatprep.subr.bf16.mxu1 %v1141_v28  ;;  %1020 = vmatmul.mubr.msk.bf16.gmra.mrb[20].mxu0 %vm127_vm0, %v88_v61 }
  0x5a   :  { %635 = vmatprep.mubr.bf16.mxu0 %v1267_v0 }
  0x5c   :  { %1105 = vmatpush3.bf16.msra.mxu1 %v1142_v29 }
 0x102   :  { %v246_v0 = vpop.f32.mrb[0].mxu1 }
 0x103   :  { %v1506_v6 = vadd.f32 %v246_v0, %v1499_v4  ;;  %v248_v7 = vpop.f32.mrb[1].mxu1 }
 0x104   :  { %v1509_v8 = vadd.f32 %v248_v7, %v1503_v5  ;;  %v250_v9 = vpop.f32.mrb[2].mxu1  ;;  %v186_v37 = vpop.f32.mrb[0].mxu0 }
 0x105   :  { %989 = vst [vmem:[%s1861_s12 + $0xc0] sm:$0xff] %v1506_v6  ;;  %v1516_v10 = vadd.f32 %v250_v9, %v1499_v4  ;;  %v252_v11 = vpop.f32.mrb[3].mxu1  ;;  %v188_v38 = vpop.f32.mrb[1].mxu0  ;;  %v1586_v40 = vadd.f32 %v186_v37, %v1499_v4 }
 0x106   :  { %990 = vst [vmem:[%s1861_s12 + $0xc8] sm:$0xff] %v1509_v8  ;;  %v1523_v12 = vadd.f32 %v252_v11, %v1503_v5  ;;  %v190_v39 = vpop.f32.mrb[2].mxu0  ;;  %v189_v42 = vadd.f32 %v188_v38, %v1503_v5 }
 0x107   :  { %v901_v13 = vpack.c.bf16 %v1516_v10, %v1506_v6  ;;  %991 = vst [vmem:[%s1861_s12 + $0xd0] sm:$0xff] %v1516_v10  ;;  %v192_v41 = vpop.f32.mrb[3].mxu0  ;;  %965 = vst [vmem:[%s1861_s12] sm:$0xff] %v1586_v40  ;;  %v1595_v44 = vadd.f32 %v190_v39, %v1499_v4  ;;  %v511_v6 = vld [vmem:[%s1857_s8] sm:$0x3] }
 0x108   :  { %v902_v14 = vpack.c.bf16 %v1523_v12, %v1509_v8  ;;  %992 = vst [vmem:[%s1861_s12 + $0xd8] sm:$0xff] %v1523_v12  ;;  %v193_v43 = vadd.f32 %v192_v41, %v1503_v5  ;;  %966 = vst [vmem:[%s1861_s12 + $0x8] sm:$0xff] %v189_v42  ;;  %v1865_v8 = vsub.s32 0, %v1490_v63  ;;  %v1866_v12 = vsub.s32 1, %v1490_v63 }
 0x109   :  { %v889_v46 = vpack.c.bf16 %v1595_v44, %v1586_v40  ;;  %967 = vst [vmem:[%s1861_s12 + $0x10] sm:$0xff] %v1595_v44  ;;  %v1214_v40 = vld [vmem:[#allocation4 + $0xf4] ss:$8 sps:$4 sm:$0xff]   ;;  %v1212_v44 = vld [vmem:[#allocation4 + $0xf0] ss:$8 sps:$4 sm:$0xff]  }
 0x10a   :  { %v256_v15 = vpop.f32.mrb[4].mxu1  ;;  %v890_v45 = vpack.c.bf16 %v193_v43, %v189_v42  ;;  %968 = vst [vmem:[%s1861_s12 + $0x18] sm:$0xff] %v193_v43  ;;  %v516_v10 = vrot.slane %v511_v6, %v1865_v8 }
 0x10b   :  { %v1538_v16 = vadd.f32 %v256_v15, %v1499_v4  ;;  %v258_v17 = vpop.f32.mrb[5].mxu1 }
 0x10c   :  { %v1541_v18 = vadd.f32 %v258_v17, %v1503_v5  ;;  %v260_v19 = vpop.f32.mrb[6].mxu1  ;;  %v196_v47 = vpop.f32.mrb[4].mxu0  ;;  %912 = vmatprep.subr.bf16.mxu0 %v890_v45 }
 0x10d   :  { %993 = vst [vmem:[%s1861_s12 + $0xe0] sm:$0xff] %v1538_v16  ;;  %v1548_v20 = vadd.f32 %v260_v19, %v1499_v4  ;;  %v262_v21 = vpop.f32.mrb[7].mxu1  ;;  %v1610_v48 = vadd.f32 %v196_v47, %v1499_v4  ;;  %v198_v49 = vpop.f32.mrb[5].mxu0 }
 0x10e   :  { %994 = vst [vmem:[%s1861_s12 + $0xe8] sm:$0xff] %v1541_v18  ;;  %v1555_v22 = vadd.f32 %v262_v21, %v1503_v5  ;;  %v1613_v50 = vadd.f32 %v198_v49, %v1503_v5  ;;  %v200_v51 = vpop.f32.mrb[6].mxu0 }
 0x10f   :  { %995 = vst [vmem:[%s1861_s12 + $0xf0] sm:$0xff] %v1548_v20  ;;  %969 = vst [vmem:[%s1861_s12 + $0x20] sm:$0xff] %v1610_v48  ;;  %v1620_v52 = vadd.f32 %v200_v51, %v1499_v4  ;;  %v202_v53 = vpop.f32.mrb[7].mxu0 }
 0x110   :  { %v904_v24 = vpack.c.bf16 %v1555_v22, %v1541_v18  ;;  %996 = vst [vmem:[%s1861_s12 + $0xf8] sm:$0xff] %v1555_v22  ;;  %970 = vst [vmem:[%s1861_s12 + $0x28] sm:$0xff] %v1613_v50  ;;  %v1627_v54 = vadd.f32 %v202_v53, %v1503_v5 }
 0x111   :  { %v891_v55 = vpack.c.bf16 %v1620_v52, %v1610_v48  ;;  %971 = vst [vmem:[%s1861_s12 + $0x30] sm:$0xff] %v1620_v52 }
 0x112   :  { %v305_v25 = vpop.f32.mrb[8].mxu1  ;;  %v892_v56 = vpack.c.bf16 %v1627_v54, %v1613_v50  ;;  %972 = vst [vmem:[%s1861_s12 + $0x38] sm:$0xff] %v1627_v54 }
 0x113   :  { %v307_v26 = vpop.f32.mrb[9].mxu1  ;;  %v1579_v32 = vadd.f32 %v305_v25, %v1499_v4 }
 0x114   :  { %v309_v27 = vpop.f32.mrb[10].mxu1  ;;  %v1573_v30 = vadd.f32 %v307_v26, %v1503_v5  ;;  %v206_v57 = vpop.f32.mrb[8].mxu0 }
 0x115   :  { %v1570_v28 = vadd.f32 %v309_v27, %v1499_v4  ;;  %v311_v29 = vpop.f32.mrb[11].mxu1  ;;  %v1642_v58 = vadd.f32 %v206_v57, %v1499_v4  ;;  %v208_v59 = vpop.f32.mrb[9].mxu0 }
 0x116   :  { %v1576_v31 = vadd.f32 %v311_v29, %v1503_v5  ;;  %v1645_v60 = vadd.f32 %v208_v59, %v1503_v5  ;;  %v210_v61 = vpop.f32.mrb[10].mxu0 }
 0x117   :  { %v314_v34 = vpack.c.bf16 %v1570_v28, %v1579_v32  ;;  %973 = vst [vmem:[%s1861_s12 + $0x40] sm:$0xff] %v1642_v58  ;;  %v1652_v62 = vadd.f32 %v210_v61, %v1499_v4  ;;  %v212_v2 = vpop.f32.mrb[11].mxu0 }
 0x118   :  { %v315_v33 = vpack.c.bf16 %v1576_v31, %v1573_v30  ;;  %974 = vst [vmem:[%s1861_s12 + $0x48] sm:$0xff] %v1645_v60  ;;  %v1659_v0 = vadd.f32 %v212_v2, %v1503_v5 }
 0x119   :  { %v893_v7 = vpack.c.bf16 %v1652_v62, %v1642_v58  ;;  %975 = vst [vmem:[%s1861_s12 + $0x50] sm:$0xff] %v1652_v62 }
 0x11a   :  { %483 = vmatprep.mubr.bf16.mxu1 %v315_v33  ;;  %v894_v9 = vpack.c.bf16 %v1659_v0, %v1645_v60  ;;  %976 = vst [vmem:[%s1861_s12 + $0x58] sm:$0xff] %v1659_v0 }
 0x11b   :  { %484 = vmatmul.mubr.bf16.vlgmr.msra.gmra.mrb[12].mxu1 %v314_v34 }
 0x11c   :  { %v216_v11 = vpop.f32.mrb[12].mxu0 }
 0x11d   :  { %v1674_v15 = vadd.f32 %v216_v11, %v1499_v4  ;;  %v218_v17 = vpop.f32.mrb[13].mxu0 }
 0x11e   :  { %v1677_v19 = vadd.f32 %v218_v17, %v1503_v5  ;;  %v220_v21 = vpop.f32.mrb[14].mxu0  ;;  %v1167_v17 = vld [vmem:[#allocation4] ss:$8 sps:$4 sm:$0xff]  }
 0x11f   :  { %977 = vst [vmem:[%s1861_s12 + $0x60] sm:$0xff] %v1674_v15  ;;  %v1684_v25 = vadd.f32 %v220_v21, %v1499_v4  ;;  %v222_v26 = vpop.f32.mrb[15].mxu0  ;;  %v1169_v21 = vld [vmem:[#allocation4 + $0x4] ss:$8 sps:$4 sm:$0xff]  }
 0x120   :  { %978 = vst [vmem:[%s1861_s12 + $0x68] sm:$0xff] %v1677_v19  ;;  %v1691_v27 = vadd.f32 %v222_v26, %v1503_v5  ;;  %844 = vmatprep.subr.bf16.mxu1 %v1169_v21  ;;  %v1170_v26 = vld [vmem:[#allocation4 + $0x10] ss:$8 sps:$4 sm:$0xff]   ;;  %v1187_v21 = vld [vmem:[#allocation4 + $0x64] ss:$8 sps:$4 sm:$0xff]  }
 0x121   :  { %v895_v29 = vpack.c.bf16 %v1684_v25, %v1674_v15  ;;  %979 = vst [vmem:[%s1861_s12 + $0x70] sm:$0xff] %v1684_v25  ;;  %845 = vmatpush1.bf16.msra.mxu1 %v1167_v17  ;;  %v1185_v17 = vld [vmem:[#allocation4 + $0x60] ss:$8 sps:$4 sm:$0xff]  }
 0x122   :  { %v896_v33 = vpack.c.bf16 %v1691_v27, %v1677_v19  ;;  %980 = vst [vmem:[%s1861_s12 + $0x78] sm:$0xff] %v1691_v27 }
 0x124   :  { %v226_v34 = vpop.f32.mrb[16].mxu0 }
 0x125   :  { %v1706_v35 = vadd.f32 %v226_v34, %v1499_v4  ;;  %v228_v36 = vpop.f32.mrb[17].mxu0  ;;  %v1175_v34 = vld [vmem:[#allocation4 + $0x24] ss:$8 sps:$4 sm:$0xff]  }
 0x126   :  { %v1709_v37 = vadd.f32 %v228_v36, %v1503_v5  ;;  %v230_v38 = vpop.f32.mrb[18].mxu0  ;;  %v1173_v36 = vld [vmem:[#allocation4 + $0x20] ss:$8 sps:$4 sm:$0xff]  }
 0x127   :  { %981 = vst [vmem:[%s1861_s12 + $0x80] sm:$0xff] %v1706_v35  ;;  %v1716_v39 = vadd.f32 %v230_v38, %v1499_v4  ;;  %v232_v41 = vpop.f32.mrb[19].mxu0  ;;  %v1178_v38 = vld [vmem:[#allocation4 + $0x34] ss:$8 sps:$4 sm:$0xff]  }
 0x128   :  { %982 = vst [vmem:[%s1861_s12 + $0x88] sm:$0xff] %v1709_v37  ;;  %v1723_v42 = vadd.f32 %v232_v41, %v1503_v5  ;;  %v1176_v41 = vld [vmem:[#allocation4 + $0x30] ss:$8 sps:$4 sm:$0xff]  }
 0x129   :  { %v897_v43 = vpack.c.bf16 %v1716_v39, %v1706_v35  ;;  %983 = vst [vmem:[%s1861_s12 + $0x90] sm:$0xff] %v1716_v39 }
 0x12a   :  { %v898_v45 = vpack.c.bf16 %v1723_v42, %v1709_v37  ;;  %984 = vst [vmem:[%s1861_s12 + $0x98] sm:$0xff] %v1723_v42 }
 0x12c   :  { %v236_v47 = vpop.f32.mrb[20].mxu0 }
 0x12d   :  { %v1738_v49 = vadd.f32 %v236_v47, %v1499_v4  ;;  %v238_v51 = vpop.f32.mrb[21].mxu0  ;;  %v1181_v47 = vld [vmem:[#allocation4 + $0x44] ss:$8 sps:$4 sm:$0xff]  }
 0x12e   :  { %v1741_v53 = vadd.f32 %v238_v51, %v1503_v5  ;;  %v240_v57 = vpop.f32.mrb[22].mxu0  ;;  %v1179_v51 = vld [vmem:[#allocation4 + $0x40] ss:$8 sps:$4 sm:$0xff]  }
 0x12f   :  { %985 = vst [vmem:[%s1861_s12 + $0xa0] sm:$0xff] %v1738_v49  ;;  %v1748_v59 = vadd.f32 %v240_v57, %v1499_v4  ;;  %v242_v61 = vpop.f32.mrb[23].mxu0  ;;  %v1184_v57 = vld [vmem:[#allocation4 + $0x54] ss:$8 sps:$4 sm:$0xff]  }
 0x130   :  { %986 = vst [vmem:[%s1861_s12 + $0xa8] sm:$0xff] %v1741_v53  ;;  %v1755_v2 = vadd.f32 %v242_v61, %v1503_v5  ;;  %v1172_v5 = vld [vmem:[#allocation4 + $0x14] ss:$8 sps:$4 sm:$0xff]   ;;  %v1182_v61 = vld [vmem:[#allocation4 + $0x50] ss:$8 sps:$4 sm:$0xff]  }
 0x131   :  { %v899_v11 = vpack.c.bf16 %v1748_v59, %v1738_v49  ;;  %987 = vst [vmem:[%s1861_s12 + $0xb0] sm:$0xff] %v1748_v59  ;;  %846 = vmatprep.subr.bf16.mxu1 %v1172_v5  ;;  %v1190_v5 = vld [vmem:[#allocation4 + $0x74] ss:$8 sps:$4 sm:$0xff]  }
 0x132   :  { %v900_v4 = vpack.c.bf16 %v1755_v2, %v1741_v53  ;;  %988 = vst [vmem:[%s1861_s12 + $0xb8] sm:$0xff] %v1755_v2  ;;  %847 = vmatpush1.bf16.msra.mxu1 %v1170_v26  ;;  %v1188_v26 = vld [vmem:[#allocation4 + $0x70] ss:$8 sps:$4 sm:$0xff]  }
 0x133   :  { %848 = vmatprep.subr.bf16.mxu1 %v1175_v34  ;;  %v1193_v34 = vld [vmem:[#allocation4 + $0x84] ss:$8 sps:$4 sm:$0xff]  }
 0x136   :  { %849 = vmatpush1.bf16.msra.mxu1 %v1173_v36  ;;  %v1191_v36 = vld [vmem:[#allocation4 + $0x80] ss:$8 sps:$4 sm:$0xff]  }
 0x137   :  { %850 = vmatprep.subr.bf16.mxu1 %v1178_v38  ;;  %v1196_v38 = vld [vmem:[#allocation4 + $0x94] ss:$8 sps:$4 sm:$0xff]  }
 0x13a   :  { %851 = vmatpush1.bf16.msra.mxu1 %v1176_v41  ;;  %v1194_v41 = vld [vmem:[#allocation4 + $0x90] ss:$8 sps:$4 sm:$0xff]  }
 0x13b   :  { %852 = vmatprep.subr.bf16.mxu1 %v1181_v47  ;;  %v1199_v47 = vld [vmem:[#allocation4 + $0xa4] ss:$8 sps:$4 sm:$0xff]  }
 0x13e   :  { %853 = vmatpush1.bf16.msra.mxu1 %v1179_v51  ;;  %v1197_v51 = vld [vmem:[#allocation4 + $0xa0] ss:$8 sps:$4 sm:$0xff]  }
 0x13f   :  { %854 = vmatprep.subr.bf16.mxu1 %v1184_v57  ;;  %v1202_v57 = vld [vmem:[#allocation4 + $0xb4] ss:$8 sps:$4 sm:$0xff]  }
 0x142   :  { %855 = vmatpush1.bf16.msra.mxu1 %v1182_v61  ;;  %v1200_v61 = vld [vmem:[#allocation4 + $0xb0] ss:$8 sps:$4 sm:$0xff]  }
 0x143   :  { %856 = vmatprep.subr.bf16.mxu1 %v1187_v21  ;;  %v1205_v21 = vld [vmem:[#allocation4 + $0xc4] ss:$8 sps:$4 sm:$0xff]  }
 0x146   :  { %857 = vmatpush1.bf16.msra.mxu1 %v1185_v17  ;;  %v1203_v17 = vld [vmem:[#allocation4 + $0xc0] ss:$8 sps:$4 sm:$0xff]  }
 0x147   :  { %858 = vmatprep.subr.bf16.mxu1 %v1190_v5  ;;  %v1208_v5 = vld [vmem:[#allocation4 + $0xd4] ss:$8 sps:$4 sm:$0xff]  }
 0x14a   :  { %859 = vmatpush1.bf16.msra.mxu1 %v1188_v26  ;;  %v1206_v26 = vld [vmem:[#allocation4 + $0xd0] ss:$8 sps:$4 sm:$0xff]  }
 0x14b   :  { %860 = vmatprep.subr.bf16.mxu1 %v1193_v34 }
 0x14e   :  { %861 = vmatpush1.bf16.msra.mxu1 %v1191_v36  ;;  %v1024_v36 = vld [vmem:[%s1855_s6] ss:$0 sm:$0xff] }
 0x14f   :  { %862 = vmatprep.subr.bf16.mxu1 %v1196_v38 }
 0x152   :  { %863 = vmatpush1.bf16.msra.mxu1 %v1194_v41 }
 0x153   :  { %864 = vmatprep.subr.bf16.mxu1 %v1199_v47 }
 0x156   :  { %865 = vmatpush1.bf16.msra.mxu1 %v1197_v51 }
 0x157   :  { %866 = vmatprep.subr.bf16.mxu1 %v1202_v57 }
 0x15a   :  { %867 = vmatpush1.bf16.msra.mxu1 %v1200_v61 }
 0x15b   :  { %868 = vmatprep.subr.bf16.mxu1 %v1205_v21 }
 0x15e   :  { %869 = vmatpush1.bf16.msra.mxu1 %v1203_v17 }
 0x15f   :  { %870 = vmatprep.subr.bf16.mxu1 %v1208_v5 }
 0x162   :  { %871 = vmatpush1.bf16.msra.mxu1 %v1206_v26 }
 0x1ee   :  { %v1106_v34 = vpop.f32.mrb[12].mxu1 }
 0x1ef   :  { %v1107_v38 = vpop.f32.mrb[13].mxu1 }
 0x1f0   :  { %v1108_v41 = vadd.f32 %v1107_v38, %v1106_v34  ;;  %v1109_v47 = vpop.f32.mrb[14].mxu1 }
 0x1f1   :  { %v1110_v51 = vpop.f32.mrb[15].mxu1 }
 0x1f2   :  { %v486_v3 = vadd.f32 %v1108_v41, %v1024_v36  ;;  %v1111_v57 = vadd.f32 %v1110_v51, %v1109_v47 }
 0x1f4   :  { %v489_v1 = vadd.f32 %v1111_v57, %v1024_v36  ;;  %v492_v61 = vmax.f32 %v486_v3, 0.0  ;;  %v1211_v3 = vld [vmem:[#allocation4 + $0xe4] ss:$8 sps:$4 sm:$0xff]  }
 0x1f5   :  { %872 = vmatprep.subr.bf16.mxu1 %v1211_v3 }
 0x1f6   :  { %v493_v23 = vmax.f32 %v489_v1, 0.0  ;;  %v1864_v1 = vpack.c.bf16 %v1548_v20, %v1538_v16 }
 0x1f8   :  { %v494_v21 = vpack.c.bf16 %v493_v23, %v492_v61  ;;  %v1209_v23 = vld [vmem:[#allocation4 + $0xe0] ss:$8 sps:$4 sm:$0xff]  }
 0x1f9   :  { %873 = vmatpush1.bf16.msra.mxu1 %v1209_v23 }
 0x1fa   :  { %636 = vmatmul.mubr.bf16.vlgmr.msra.gmra.mrb[24].mxu0 %v494_v21  ;;  %874 = vmatprep.subr.bf16.mxu1 %v1214_v40 }
 0x1fb   :  { %913 = vmatpush1.bf16.xpose.msra.mxu0 %v889_v46 }
 0x1fc   :  { %914 = vmatprep.subr.bf16.mxu0 %v892_v56 }
 0x1fd   :  { %875 = vmatpush1.bf16.msra.mxu1 %v1212_v44 }
 0x203   :  { %915 = vmatpush1.bf16.xpose.msra.mxu0 %v891_v55 }
 0x204   :  { %916 = vmatprep.subr.bf16.mxu0 %v894_v9 }
 0x20b   :  { %917 = vmatpush1.bf16.xpose.msra.mxu0 %v893_v7 }
 0x20c   :  { %918 = vmatprep.subr.bf16.mxu0 %v896_v33 }
 0x213   :  { %919 = vmatpush1.bf16.xpose.msra.mxu0 %v895_v29 }
 0x214   :  { %920 = vmatprep.subr.bf16.mxu0 %v898_v45 }
 0x21b   :  { %921 = vmatpush1.bf16.xpose.msra.mxu0 %v897_v43 }
 0x21c   :  { %922 = vmatprep.subr.bf16.mxu0 %v900_v4 }
 0x223   :  { %923 = vmatpush1.bf16.xpose.msra.mxu0 %v899_v11 }
 0x224   :  { %924 = vmatprep.subr.bf16.mxu0 %v902_v14 }
 0x22b   :  { %925 = vmatpush1.bf16.xpose.msra.mxu0 %v901_v13  ;;  %v520_v13 = vrot.slane %v511_v6, %v1866_v12 }
 0x22c   :  { %926 = vmatprep.subr.bf16.mxu0 %v904_v24 }
 0x233   :  { %927 = vmatpush1.bf16.xpose.msra.mxu0 %v1864_v1 }
 0x2cd   :  { %v637_v14 = vpop.f32.mrb[24].mxu0 }
 0x2ce   :  { %v638_v16 = vadd.f32 %v637_v14, %v516_v10  ;;  %v639_v18 = vpop.f32.mrb[25].mxu0 }
 0x2cf   :  { %v640_v20 = vadd.f32 %v639_v18, %v520_v13  ;;  %v641_v22 = vpop.f32.mrb[26].mxu0 }
 0x2d0   :  { %v646_v24 = vadd.f32 %v638_v16, %v1579_v32  ;;  %v642_v46 = vadd.f32 %v641_v22, %v516_v10  ;;  %v643_v48 = vpop.f32.mrb[27].mxu0 }
 0x2d1   :  { %v647_v50 = vadd.f32 %v640_v20, %v1573_v30  ;;  %v644_v52 = vadd.f32 %v643_v48, %v520_v13 }
 0x2d2   :  { %961 = vst [vmem:[%s1860_s11] sm:$0xff] %v646_v24  ;;  %v648_v54 = vadd.f32 %v642_v46, %v1570_v28 }
 0x2d3   :  { %962 = vst [vmem:[%s1860_s11 + $0x8] sm:$0xff] %v647_v50  ;;  %v649_v63 = vadd.f32 %v644_v52, %v1576_v31  ;;  %v1089_v31 = vld [vmem:[%s1851_s2] ss:$0 sm:$0xff] }
 0x2d4   :  { %v650_v55 = vpack.c.bf16 %v648_v54, %v646_v24  ;;  %963 = vst [vmem:[%s1860_s11 + $0x10] sm:$0xff] %v648_v54 }
 0x2d5   :  { %964 = vst [vmem:[%s1860_s11 + $0x18] sm:$0xff] %v649_v63  ;;  %v651_v30 = vpack.c.bf16 %v649_v63, %v647_v50 }
 0x2d7   :  { %876 = vmatprep.mubr.bf16.mxu1 %v651_v30 }
 0x2d8   :  { %877 = vmatmul.mubr.bf16.vlgmr.msra.gmra.mrb[16].mxu1 %v650_v55 }
 0x3ab   :  { %v878_v32 = vpop.f32.mrb[16].mxu1 }
 0x3ac   :  { %v880_v28 = vpop.f32.mrb[17].mxu1 }
 0x3ad   :  { %v882_v56 = vpop.f32.mrb[18].mxu1 }
 0x3ae   :  { %v887_v58 = vpack.c.bf16 %v882_v56, %v878_v32  ;;  %v884_v60 = vpop.f32.mrb[19].mxu1 }
 0x3af   :  { %v888_v62 = vpack.c.bf16 %v884_v60, %v880_v28 }
 0x3b1   :  { %944 = vmatprep.mubr.bf16.mxu0 %v888_v62 }
 0x3b2   :  { %945 = vmatmul.mubr.bf16.vlgmr.msra.gmra.mrb[28].mxu0 %v887_v58 }
 0x485   :  { %v946_v0 = vpop.f32.mrb[28].mxu0 }
 0x486   :  { %v947_v7 = vadd.f32 %v1089_v31, %v946_v0  ;;  %v948_v9 = vpop.f32.mrb[29].mxu0 }
 0x487   :  { %v949_v15 = vpop.f32.mrb[30].mxu0 }
 0x488   :  { %v951_v19 = vpop.f32.mrb[31].mxu0  ;;  %953 = vmax.xlane.f32.xlu0 %v947_v7  ;;  %v950_v25 = vadd.f32 %v1089_v31, %v949_v15 }
 0x48c   :  { %955 = vmax.xlane.f32.xlu0 %v950_v25 }
 0x515   :  { %v954_v27 = vpop.xlane.xlu0 %953 }
 0x516   :  { %v957_v29 = vsub.f32 %v947_v7, %v954_v27 }
 0x518   :  { %959 = vst [vmem:[%s1859_s10] sm:$0xff] %v957_v29 }
 0x519   :  { %v956_v33 = vpop.xlane.xlu0 %955 }
 0x51a   :  { %v958_v35 = vsub.f32 %v950_v25, %v956_v33 }
 0x51c   :  { %960 = vst [vmem:[%s1859_s10 + $0x8] sm:$0xff] %v958_v35 }
 0x51d   :  { %1009 = vsyncpa [#allocation3], 1 }
 0x51e   :  { %1010 = vsyncpa [#allocation5], 1 }

</bundles_post_ra>
